<compile_context>
chip_gen: v7x
topology: tpu7x:2x2x1
jax: 0.10.0
libtpu: 0.0.40
codegen_flags: <defaults>
</compile_context>

<pallas_src>
import functools

import jax
import jax.numpy as jnp
from jax.experimental import pallas as pl
from jax.experimental.pallas import tpu as pltpu


# ----------------------------- Pallas kernel ------------------------------- #
def _forward_kernel(x_ref, thc_ref, w1_ref, w2_ref, b2_ref, out_ref):
    """One batch tile of the fused conditional-MLP noise predictor.

    x_ref  : (BM, D)    f32   flattened x_t (cast to bf16 in-kernel)
    thc_ref: (BM, HID)  f32   time_table[t]@Wt + b1 + dropout(classes)@Wc
    w1_ref : (D, HID)   bf16
    w2_ref : (HID, D)   bf16
    b2_ref : (1, D)     f32
    out_ref: (BM, D)    bf16
    """
    # Layer 1: K=1024 bf16 MXU contraction, f32 accumulate.  The f32->bf16
    # cast happens here (VPU work hidden under the DMA) instead of a separate
    # wrapper pass over HBM.
    x_bf = x_ref[...].astype(jnp.bfloat16)
    h = jnp.dot(x_bf, w1_ref[...], preferred_element_type=jnp.float32)
    # Time + class + bias term and ReLU stay f32 on the VPU.
    h = jnp.maximum(h + thc_ref[...], 0.0)
    # Layer 2: bf16 LHS, f32 accumulate, f32 bias add, bf16 store.
    out = jnp.dot(h.astype(jnp.bfloat16), w2_ref[...],
                  preferred_element_type=jnp.float32)
    out_ref[...] = (out + b2_ref[...]).astype(out_ref.dtype)


# ------------------------------ model wrapper ------------------------------ #
def make_diffusion_model(key, *, T=100, img_channels=4, img_size=16,
                         num_classes=16, time_emb=32, hidden=256,
                         class_dropout=0.5):
    """Builds deterministic parameters, mirroring DiffusionModel.__init__."""
    D = img_channels * img_size * img_size

    # Diffusion schedule buffers (variance_schedule='linear', float32).
    betas = jnp.linspace(0.0001, 0.03, T, dtype=jnp.float32)
    alphas = 1.0 - betas
    alpha_cum_prod = jnp.cumprod(alphas)
    params = {
        "betas": betas,
        "alphas": alphas,
        "alpha_cum_prod": alpha_cum_prod,
        "one_minus_alpha_cumprod": 1.0 - alpha_cum_prod,
        "sqrt_alpha_inverse": 1.0 / jnp.sqrt(alphas),
        "sqrt_alpha_cumprod": jnp.sqrt(alpha_cum_prod),
        "sqrt_one_minus_alpha_cumprod": jnp.sqrt(1.0 - alpha_cum_prod),
    }

    # TODO(synk): `net` is an external ctor argument in the PyTorch module; a
    #             small conditional MLP noise predictor is synthesized here.
    ks = jax.random.split(key, 5)
    time_table = jax.random.normal(ks[0], (T, time_emb), jnp.float32)
    w1 = jax.random.normal(ks[1], (D, hidden), jnp.float32) * 0.02
    wt = jax.random.normal(ks[2], (time_emb, hidden), jnp.float32) * 0.02
    wc = jax.random.normal(ks[3], (num_classes, hidden), jnp.float32) * 0.02
    b1 = jnp.zeros((hidden,), jnp.float32)
    w2 = jax.random.normal(ks[4], (hidden, D), jnp.float32) * 0.02
    b2 = jnp.zeros((1, D), jnp.float32)

    # Kernel-facing parameters: time embedding folded into a (T, HID) table,
    # class projection kept separate (tiny, applied in the wrapper), weights
    # in bf16 for the MXU.
    params["time_hidden"] = time_table @ wt + b1[None, :]            # (T, HID) f32
    params["wc"] = wc                                                 # (NC, HID) f32
    params["w1"] = w1.astype(jnp.bfloat16)
    params["w2"] = w2.astype(jnp.bfloat16)
    params["b2"] = b2
    params["class_dropout"] = class_dropout
    params["dims"] = (img_channels, img_size, num_classes, time_emb, hidden)
    return params


@functools.partial(jax.jit, static_argnames=("dropout_p",))
def _forward_jit(dropout_key, x_flat, t_s, classes_f, time_hidden, wc,
                 w1, w2, b2, *, dropout_p):
    B, D = x_flat.shape
    HID = w2.shape[0]

    # torch.nn.Dropout (training mode) on classes.float().
    # TODO(synk): mask drawn with jax.random here rather than the in-kernel
    #             TPU hardware PRNG (no CPU/interpret lowering for prng_seed).
    if dropout_p >= 1.0:
        classes_d = jnp.zeros_like(classes_f)
    elif dropout_p > 0.0:
        keep = jax.random.bernoulli(dropout_key, 1.0 - dropout_p, classes_f.shape)
        classes_d = jnp.where(keep, classes_f * (1.0 / (1.0 - dropout_p)), 0.0)
    else:
        classes_d = classes_f

    # Fold the tiny class path ((B,NC)@(NC,HID)) and the gathered time/bias
    # rows into one per-row f32 vector, keeping layer 1 a clean K=D matmul.
    thc = time_hidden[t_s] + classes_d @ wc                      # (B, HID) f32

    # ---- batch tiling -------------------------------------------------------
    if B <= 256:
        # Small batch: one tile; weight-DMA bound, a v7x core split would only
        # make each core re-read the full weights.
        BM = B
    else:
        # Large batch: up-to-512-row tiles amortize per-step overhead and fill
        # the 256-row v6e/v7x MXU; >=2 tiles so megacore splits the batch.
        BM = max(128, min(512, ((B // 2) // 128) * 128))
    n_tiles = pl.cdiv(B, BM)
    Bp = n_tiles * BM
    if Bp != B:
        # Never fall back to one giant (B, D) tile: pad to a BM multiple.
        x_flat = jnp.pad(x_flat, ((0, Bp - B), (0, 0)))
        thc = jnp.pad(thc, ((0, Bp - B), (0, 0)))

    # NOTE: the constant weight operands are small (~1 MiB double-buffered by
    # the default pipeline); explicit single-buffering skipped for robustness.
    out = pl.pallas_call(
        _forward_kernel,
        out_shape=jax.ShapeDtypeStruct((Bp, D), jnp.bfloat16),
        grid=(n_tiles,),
        in_specs=[
            pl.BlockSpec((BM, D), lambda i: (i, 0)),      # x_flat      f32
            pl.BlockSpec((BM, HID), lambda i: (i, 0)),    # time+class  f32
            pl.BlockSpec((D, HID), lambda i: (0, 0)),     # W1          bf16
            pl.BlockSpec((HID, D), lambda i: (0, 0)),     # W2          bf16
            pl.BlockSpec((1, D), lambda i: (0, 0)),       # b2          f32
        ],
        out_specs=pl.BlockSpec((BM, D), lambda i: (i, 0)),
        compiler_params=pltpu.CompilerParams(
            dimension_semantics=("parallel",)),            # megacore at large B
    )(x_flat, thc, w1, w2, b2)
    return out[:B]


def diffusion_forward(params, x_t, t_s, classes, dropout_key):
    """DiffusionModel.forward(x_t, t_s, classes) with training-mode dropout.

    Returns bf16 (kernel emits bf16 to halve HBM writeback); values match the
    f32 reference to ~1e-2 relative.
    """
    B, C, H, W = x_t.shape
    x_flat = x_t.astype(jnp.float32).reshape(B, C * H * W)
    classes_f = classes.astype(jnp.float32)                 # classes.float()
    out_flat = _forward_jit(
        dropout_key, x_flat, t_s, classes_f, params["time_hidden"],
        params["wc"], params["w1"], params["w2"], params["b2"],
        dropout_p=float(params["class_dropout"]))
    return out_flat.reshape(B, C, H, W)


# ----------------------------------- main ----------------------------------- #
if __name__ == "__main__":
    key = jax.random.PRNGKey(0)
    k_param, k_x, k_t, k_c, k_drop = jax.random.split(key, 5)

    B, C, HW = 8, 4, 16
    NUM_CLASSES, T = 16, 100

    params = make_diffusion_model(
        k_param, T=T, img_channels=C, img_size=HW,
        num_classes=NUM_CLASSES, class_dropout=0.5)

    x_t = jax.random.normal(k_x, (B, C, HW, HW), jnp.float32)       # NCHW
    t_s = jax.random.randint(k_t, (B,), 0, T, dtype=jnp.int32)
    cls_ids = jax.random.randint(k_c, (B,), 0, NUM_CLASSES, dtype=jnp.int32)
    classes = jax.nn.one_hot(cls_ids, NUM_CLASSES, dtype=jnp.float32)

    out = diffusion_forward(params, x_t, t_s, classes, dropout_key=k_drop)
    jax.block_until_ready(out)
    assert out.shape == (B, C, HW, HW) and out.dtype == jnp.bfloat16
    assert bool(jnp.all(jnp.isfinite(out.astype(jnp.float32))))
    print("KERNEL_OK")
</pallas_src>

<mosaic_0001>
module attributes {stable_mosaic.version = 11 : i64} {
  func.func @_forward_kernel(%arg0: i32, %arg1: memref<8x1024xf32, #tpu.memory_space<vmem>>, %arg2: memref<8x256xf32, #tpu.memory_space<vmem>>, %arg3: memref<1024x256xbf16, #tpu.memory_space<vmem>>, %arg4: memref<256x1024xbf16, #tpu.memory_space<vmem>>, %arg5: memref<1x1024xf32, #tpu.memory_space<vmem>>, %arg6: memref<8x1024xbf16, #tpu.memory_space<vmem>>) attributes {dimension_semantics = [#tpu.dimension_semantics<parallel>], iteration_bounds = array<i64: 1>, scalar_prefetch = 0 : i64, scratch_operands = 0 : i64, tpu.core_type = #tpu.core_type<tc>, window_params = [{transform_indices = @transform_0, window_bounds = array<i64: 8, 1024>}, {transform_indices = @transform_1, window_bounds = array<i64: 8, 256>}, {pipeline_mode = #tpu.pipeline_mode<synchronous>, transform_indices = @transform_2, window_bounds = array<i64: 1024, 256>}, {pipeline_mode = #tpu.pipeline_mode<synchronous>, transform_indices = @transform_3, window_bounds = array<i64: 256, 1024>}, {pipeline_mode = #tpu.pipeline_mode<synchronous>, transform_indices = @transform_4, window_bounds = array<i64: 1, 1024>}, {transform_indices = @transform_5, window_bounds = array<i64: 8, 1024>}]} {
    %c0 = arith.constant 0 : index
    %c0_0 = arith.constant 0 : index
    %0 = vector.load %arg1[%c0, %c0_0] : memref<8x1024xf32, #tpu.memory_space<vmem>>, vector<8x1024xf32>
    %1 = arith.truncf %0 : vector<8x1024xf32> to vector<8x1024xbf16>
    %c0_1 = arith.constant 0 : index
    %c0_2 = arith.constant 0 : index
    %2 = vector.load %arg3[%c0_1, %c0_2] : memref<1024x256xbf16, #tpu.memory_space<vmem>>, vector<1024x256xbf16>
    %cst = arith.constant dense<0.000000e+00> : vector<8x256xf32>
    %3 = tpu.matmul %1, %2, %cst {dimension_numbers = #tpu.dot_dimension_numbers<[1], [0], [0], [1], [0, 0, 1, 1], [], []>} : vector<8x1024xbf16>, vector<1024x256xbf16>, vector<8x256xf32> -> vector<8x256xf32>
    %c0_3 = arith.constant 0 : index
    %c0_4 = arith.constant 0 : index
    %4 = vector.load %arg2[%c0_3, %c0_4] : memref<8x256xf32, #tpu.memory_space<vmem>>, vector<8x256xf32>
    %5 = arith.addf %3, %4 : vector<8x256xf32>
    %cst_5 = arith.constant 0.000000e+00 : f32
    %6 = vector.broadcast %cst_5 : f32 to vector<8x256xf32>
    %7 = arith.maximumf %5, %6 : vector<8x256xf32>
    %8 = arith.truncf %7 : vector<8x256xf32> to vector<8x256xbf16>
    %c0_6 = arith.constant 0 : index
    %c0_7 = arith.constant 0 : index
    %9 = vector.load %arg4[%c0_6, %c0_7] : memref<256x1024xbf16, #tpu.memory_space<vmem>>, vector<256x1024xbf16>
    %cst_8 = arith.constant dense<0.000000e+00> : vector<8x1024xf32>
    %10 = tpu.matmul %8, %9, %cst_8 {dimension_numbers = #tpu.dot_dimension_numbers<[1], [0], [0], [1], [0, 0, 1, 1], [], []>} : vector<8x256xbf16>, vector<256x1024xbf16>, vector<8x1024xf32> -> vector<8x1024xf32>
    %c0_9 = arith.constant 0 : index
    %c0_10 = arith.constant 0 : index
    %11 = vector.load %arg5[%c0_9, %c0_10] : memref<1x1024xf32, #tpu.memory_space<vmem>>, vector<1x1024xf32>
    %12 = vector.broadcast %11 : vector<1x1024xf32> to vector<8x1024xf32>
    %13 = arith.addf %10, %12 : vector<8x1024xf32>
    %14 = arith.truncf %13 : vector<8x1024xf32> to vector<8x1024xbf16>
    %c0_11 = arith.constant 0 : index
    %c0_12 = arith.constant 0 : index
    %15 = vector.load %arg6[%c0_11, %c0_12] : memref<8x1024xbf16, #tpu.memory_space<vmem>>, vector<8x1024xbf16>
    tpu.vector_store %arg6[%c0_11, %c0_12], %14 {strides = array<i32>} : memref<8x1024xbf16, #tpu.memory_space<vmem>>, vector<8x1024xbf16>,
    return
  }
  func.func @transform_0(%arg0: i32) -> (i32, i32) {
    %c0_i32 = arith.constant 0 : i32
    %c0_i32_0 = arith.constant 0 : i32
    return %arg0, %c0_i32 : i32, i32
  }
  func.func @transform_1(%arg0: i32) -> (i32, i32) {
    %c0_i32 = arith.constant 0 : i32
    %c0_i32_0 = arith.constant 0 : i32
    return %arg0, %c0_i32 : i32, i32
  }
  func.func @transform_2(%arg0: i32) -> (i32, i32) {
    %c0_i32 = arith.constant 0 : i32
    %c0_i32_0 = arith.constant 0 : i32
    %c0_i32_1 = arith.constant 0 : i32
    return %c0_i32, %c0_i32_0 : i32, i32
  }
  func.func @transform_3(%arg0: i32) -> (i32, i32) {
    %c0_i32 = arith.constant 0 : i32
    %c0_i32_0 = arith.constant 0 : i32
    %c0_i32_1 = arith.constant 0 : i32
    return %c0_i32, %c0_i32_0 : i32, i32
  }
  func.func @transform_4(%arg0: i32) -> (i32, i32) {
    %c0_i32 = arith.constant 0 : i32
    %c0_i32_0 = arith.constant 0 : i32
    %c0_i32_1 = arith.constant 0 : i32
    return %c0_i32, %c0_i32_0 : i32, i32
  }
  func.func @transform_5(%arg0: i32) -> (i32, i32) {
    %c0_i32 = arith.constant 0 : i32
    %c0_i32_0 = arith.constant 0 : i32
    return %arg0, %c0_i32 : i32, i32
  }
}

</mosaic_0001>

<bundles_post_ra>
// kernel: _forward_jit.1
= control target key start
LH: loop header
LB: loop body
LE: loop exit
PB: predicated region body
PF: predicated region fallthrough
CT: control target
= control target key end

     0   :  { %10 = vsyncpa [#allocation3], 0  ;;  %s2696_s0 = inlined_call_operand.vmem [shape: f32[8,1024], index: 0, kind: input, shape index: {}]   ;;  %s2697_s1 = inlined_call_operand.vmem [shape: f32[8,256], index: 1, kind: input, shape index: {}]   ;;  %s2698_s2 = inlined_call_operand.hbm [shape: bf16[1024,256], index: 2, kind: input, shape index: {}]   ;;  %s2699_s3 = inlined_call_operand.hbm [shape: bf16[256,1024], index: 3, kind: input, shape index: {}]   ;;  %s2700_s4 = inlined_call_operand.vmem [shape: f32[1,1024], index: 4, kind: input, shape index: {}]   ;;  %s2701_s5 = inlined_call_operand.hbm [shape: bf16[8,1024], index: 5, kind: output, shape index: {}]  }
   0x1   :  { %11 = vsyncpa [#allocation6], 0 }
   0x2   :  { %12 = vsyncpa [#allocation4], 0  ;;  %s2578_s18 = smov [#allocation2]   ;;  %s2506_s22 = scalar_lea.hbm %s2698_s2, 16384 }
   0x3   :  { %s22_s19 = sshll.u32 %s2578_s18, 4  ;;  %p2507_p0 = scmp.ne.s32.totalorder %s2698_s2, %s2506_s22  ;;  %s23_s19 = int_to_ptr.vmem [resolvable:$true] %s22_s19 }
   0x4   :  { %p2510_p1 = scmp.lt.u32.totalorder %s2506_s22, %s2698_s2 }
   0x6   :  { %p2512_p2 = pnand %p2510_p1, %p2507_p0 }
   0x8   :  { %2515 = shalt.err (!%p2512_p2)
}
   0x9   :  { %s2516_s27 = scalar_lea.vmem %s23_s19, 16384  ;;  %p2521_p4 = scmp.lt.s32.totalorder %s23_s19, %s23_s19 }
   0xa   :  { %p2517_p3 = scmp.ne.s32.totalorder %s23_s19, %s2516_s27  ;;  %p2522_p5 = scmp.lt.s32.totalorder %s2516_s27, %s2516_s27 }
   0xc   :  { %p2523_p6 = por %p2522_p5, %p2521_p4 }
   0xe   :  { %p2524_p7 = pnand %p2523_p6, %p2517_p3 }
  0x10   :  { %2527 = shalt.err (!%p2524_p7)
}
  0x11   :  { %s2579_s28 = smov 128   ;;  %s2580_s29 = smov 8  }
  0x12   :  { %28 = dma.hbm_to_vmem [thread:$0]  %s2698_s2, 16384, %s23_s19, [#allocation3], %s2579_s28, %s2579_s28, %s2580_s29  }
  0x13   :  { %s2581_s7 = smov [#allocation5]   ;;  %s2528_s11 = scalar_lea.hbm %s2699_s3, 16384 }
  0x14   :  { %s34_s8 = sshll.u32 %s2581_s7, 4  ;;  %p2529_p8 = scmp.ne.s32.totalorder %s2699_s3, %s2528_s11  ;;  %s35_s8 = int_to_ptr.vmem [resolvable:$true] %s34_s8 }
  0x15   :  { %p2532_p9 = scmp.lt.u32.totalorder %s2528_s11, %s2699_s3 }
  0x17   :  { %p2534_p10 = pnand %p2532_p9, %p2529_p8 }
  0x19   :  { %2537 = shalt.err (!%p2534_p10)
}
  0x1a   :  { %s2538_s16 = scalar_lea.vmem %s35_s8, 16384  ;;  %p2543_p12 = scmp.lt.s32.totalorder %s35_s8, %s35_s8 }
  0x1b   :  { %p2539_p11 = scmp.ne.s32.totalorder %s35_s8, %s2538_s16  ;;  %p2544_p13 = scmp.lt.s32.totalorder %s2538_s16, %s2538_s16 }
  0x1d   :  { %p2545_p0 = por %p2544_p13, %p2543_p12 }
  0x1f   :  { %p2546_p1 = pnand %p2545_p0, %p2539_p11 }
  0x21   :  { %2549 = shalt.err (!%p2546_p1)
}
  0x22   :  { %s2582_s2 = smov 512   ;;  %s2583_s17 = smov 32  }
  0x23   :  { %40 = dma.hbm_to_vmem [thread:$0]  %s2699_s3, 16384, %s35_s8, [#allocation6], %s2582_s2, %s2582_s2, %s2583_s17  }
  0x24   :  { %2572 = dma.done.wait [#allocation3], 16384  }
  0x25   :  { %2573 = vsyncadd [#allocation3], 4294950912 }
  0x26   :  { %2574 = dma.done.wait [#allocation6], 16384  }
  0x27   :  { %2575 = vsyncadd [#allocation6], 4294950912  ;;  %v2314_v0 = vld [vmem:[#allocation2 + $0x4] ss:$8 sps:$4 sm:$0xff]   ;;  %v2316_v1 = vld [vmem:[#allocation2] ss:$8 sps:$4 sm:$0xff]  }
  0x28   :  { %835 = vmatprep.subr.bf16.mxu0 %v2314_v0  ;;  %v2317_v2 = vld [vmem:[#allocation2 + $0x14] ss:$8 sps:$4 sm:$0xff]   ;;  %v2319_v3 = vld [vmem:[#allocation2 + $0x10] ss:$8 sps:$4 sm:$0xff]   ;;  %v2320_v4 = vld [vmem:[#allocation2 + $0x24] ss:$8 sps:$4 sm:$0xff]  }
  0x29   :  { %836 = vmatpush1.bf16.msra.mxu0 %v2316_v1  ;;  %v2322_v5 = vld [vmem:[#allocation2 + $0x20] ss:$8 sps:$4 sm:$0xff]   ;;  %v2323_v6 = vld [vmem:[#allocation2 + $0x34] ss:$8 sps:$4 sm:$0xff]   ;;  %v2325_v7 = vld [vmem:[#allocation2 + $0x30] ss:$8 sps:$4 sm:$0xff]  }
  0x2a   :  { %837 = vmatprep.subr.bf16.mxu0 %v2317_v2  ;;  %v2326_v8 = vld [vmem:[#allocation2 + $0x44] ss:$8 sps:$4 sm:$0xff]   ;;  %v2328_v9 = vld [vmem:[#allocation2 + $0x40] ss:$8 sps:$4 sm:$0xff]   ;;  %v2329_v10 = vld [vmem:[#allocation2 + $0x54] ss:$8 sps:$4 sm:$0xff]  }
  0x2b   :  { %v2331_v11 = vld [vmem:[#allocation2 + $0x50] ss:$8 sps:$4 sm:$0xff]   ;;  %v2332_v12 = vld [vmem:[#allocation2 + $0x64] ss:$8 sps:$4 sm:$0xff]   ;;  %v2334_v15 = vld [vmem:[#allocation2 + $0x60] ss:$8 sps:$4 sm:$0xff]  }
  0x2c   :  { %v50_v13 = vld [vmem:[%s2696_s0 + $0x8] sm:$0xff]  ;;  %v2335_v16 = vld [vmem:[#allocation2 + $0x74] ss:$8 sps:$4 sm:$0xff]   ;;  %v2337_v17 = vld [vmem:[#allocation2 + $0x70] ss:$8 sps:$4 sm:$0xff]  }
  0x2d   :  { %838 = vmatpush1.bf16.msra.mxu0 %v2319_v3  ;;  %v58_v14 = vpack.c.bf16 %v50_v13, %v50_v13  ;;  %v2338_v18 = vld [vmem:[#allocation2 + $0x84] ss:$8 sps:$4 sm:$0xff]   ;;  %v2340_v19 = vld [vmem:[#allocation2 + $0x80] ss:$8 sps:$4 sm:$0xff]   ;;  %v2341_v20 = vld [vmem:[#allocation2 + $0x94] ss:$8 sps:$4 sm:$0xff]  }
  0x2e   :  { %839 = vmatprep.subr.bf16.mxu0 %v2320_v4  ;;  %v2343_v21 = vld [vmem:[#allocation2 + $0x90] ss:$8 sps:$4 sm:$0xff]   ;;  %v2344_v22 = vld [vmem:[#allocation2 + $0xa4] ss:$8 sps:$4 sm:$0xff]   ;;  %v2346_v23 = vld [vmem:[#allocation2 + $0xa0] ss:$8 sps:$4 sm:$0xff]  }
  0x2f   :  { %867 = vmatprep.mubr.bf16.mxu0 %v58_v14  ;;  %v2347_v24 = vld [vmem:[#allocation2 + $0xb4] ss:$8 sps:$4 sm:$0xff]   ;;  %v2349_v25 = vld [vmem:[#allocation2 + $0xb0] ss:$8 sps:$4 sm:$0xff]   ;;  %v2350_v26 = vld [vmem:[#allocation2 + $0xc4] ss:$8 sps:$4 sm:$0xff]  }
  0x30   :  { %v2352_v27 = vld [vmem:[#allocation2 + $0xc0] ss:$8 sps:$4 sm:$0xff]   ;;  %v2353_v28 = vld [vmem:[#allocation2 + $0xd4] ss:$8 sps:$4 sm:$0xff]   ;;  %v2355_v29 = vld [vmem:[#allocation2 + $0xd0] ss:$8 sps:$4 sm:$0xff]  }
  0x31   :  { %840 = vmatpush1.bf16.msra.mxu0 %v2322_v5  ;;  %v2356_v30 = vld [vmem:[#allocation2 + $0xe4] ss:$8 sps:$4 sm:$0xff]   ;;  %v2358_v31 = vld [vmem:[#allocation2 + $0xe0] ss:$8 sps:$4 sm:$0xff]   ;;  %v2359_v32 = vld [vmem:[#allocation2 + $0xf4] ss:$8 sps:$4 sm:$0xff]  }
  0x32   :  { %841 = vmatprep.subr.bf16.mxu0 %v2323_v6  ;;  %v2361_v33 = vld [vmem:[#allocation2 + $0xf0] ss:$8 sps:$4 sm:$0xff]   ;;  %v2364_v34 = vld [vmem:[#allocation2 + $0x104] ss:$8 sps:$4 sm:$0xff]   ;;  %v2362_v38 = vld [vmem:[#allocation2 + $0x100] ss:$8 sps:$4 sm:$0xff]  }
  0x33   :  { %v49_v35 = vld [vmem:[%s2696_s0] sm:$0xff]  ;;  %v52_v36 = vld [vmem:[%s2696_s0 + $0x18] sm:$0xff]  ;;  %v51_v6 = vld [vmem:[%s2696_s0 + $0x10] sm:$0xff] }
  0x34   :  { %v57_v37 = vpack.c.bf16 %v49_v35, %v49_v35  ;;  %v60_v39 = vpack.c.bf16 %v52_v36, %v52_v36  ;;  %v2367_v40 = vld [vmem:[#allocation2 + $0x114] ss:$8 sps:$4 sm:$0xff]   ;;  %v2365_v41 = vld [vmem:[#allocation2 + $0x110] ss:$8 sps:$4 sm:$0xff]   ;;  %v2370_v42 = vld [vmem:[#allocation2 + $0x124] ss:$8 sps:$4 sm:$0xff]  }
  0x35   :  { %842 = vmatpush1.bf16.msra.mxu0 %v2325_v7  ;;  %v2368_v43 = vld [vmem:[#allocation2 + $0x120] ss:$8 sps:$4 sm:$0xff]   ;;  %v2373_v44 = vld [vmem:[#allocation2 + $0x134] ss:$8 sps:$4 sm:$0xff]   ;;  %v2371_v45 = vld [vmem:[#allocation2 + $0x130] ss:$8 sps:$4 sm:$0xff]  }
  0x36   :  { %843 = vmatprep.subr.bf16.mxu0 %v2326_v8  ;;  %v2376_v46 = vld [vmem:[#allocation2 + $0x144] ss:$8 sps:$4 sm:$0xff]   ;;  %v2374_v47 = vld [vmem:[#allocation2 + $0x140] ss:$8 sps:$4 sm:$0xff]   ;;  %v2379_v48 = vld [vmem:[#allocation2 + $0x154] ss:$8 sps:$4 sm:$0xff]  }
  0x37   :  { %v2377_v49 = vld [vmem:[#allocation2 + $0x150] ss:$8 sps:$4 sm:$0xff]   ;;  %v2382_v50 = vld [vmem:[#allocation2 + $0x164] ss:$8 sps:$4 sm:$0xff]   ;;  %v2380_v51 = vld [vmem:[#allocation2 + $0x160] ss:$8 sps:$4 sm:$0xff]  }
  0x38   :  { %v2385_v52 = vld [vmem:[#allocation2 + $0x174] ss:$8 sps:$4 sm:$0xff]   ;;  %v2383_v53 = vld [vmem:[#allocation2 + $0x170] ss:$8 sps:$4 sm:$0xff]   ;;  %v2388_v54 = vld [vmem:[#allocation2 + $0x184] ss:$8 sps:$4 sm:$0xff]  }
  0x39   :  { %844 = vmatpush1.bf16.msra.mxu0 %v2328_v9  ;;  %v2386_v55 = vld [vmem:[#allocation2 + $0x180] ss:$8 sps:$4 sm:$0xff]   ;;  %v2391_v56 = vld [vmem:[#allocation2 + $0x194] ss:$8 sps:$4 sm:$0xff]   ;;  %v2389_v57 = vld [vmem:[#allocation2 + $0x190] ss:$8 sps:$4 sm:$0xff]   ;;  %v59_v9 = vpack.c.bf16 %v51_v6, %v51_v6 }
  0x3a   :  { %845 = vmatprep.subr.bf16.mxu0 %v2329_v10  ;;  %v2394_v58 = vld [vmem:[#allocation2 + $0x1a4] ss:$8 sps:$4 sm:$0xff]   ;;  %v2392_v59 = vld [vmem:[#allocation2 + $0x1a0] ss:$8 sps:$4 sm:$0xff]   ;;  %v2397_v60 = vld [vmem:[#allocation2 + $0x1b4] ss:$8 sps:$4 sm:$0xff]  }
  0x3b   :  { %v2395_v61 = vld [vmem:[#allocation2 + $0x1b0] ss:$8 sps:$4 sm:$0xff]   ;;  %v2400_v62 = vld [vmem:[#allocation2 + $0x1c4] ss:$8 sps:$4 sm:$0xff]   ;;  %v2398_v63 = vld [vmem:[#allocation2 + $0x1c0] ss:$8 sps:$4 sm:$0xff]  }
  0x3c   :  { %v2403_v0 = vld [vmem:[#allocation2 + $0x1d4] ss:$8 sps:$4 sm:$0xff]   ;;  %v2401_v1 = vld [vmem:[#allocation2 + $0x1d0] ss:$8 sps:$4 sm:$0xff]   ;;  %v2406_v2 = vld [vmem:[#allocation2 + $0x1e4] ss:$8 sps:$4 sm:$0xff]  }
  0x3d   :  { %846 = vmatpush1.bf16.msra.mxu0 %v2331_v11  ;;  %v2404_v3 = vld [vmem:[#allocation2 + $0x1e0] ss:$8 sps:$4 sm:$0xff]   ;;  %v2409_v4 = vld [vmem:[#allocation2 + $0x1f4] ss:$8 sps:$4 sm:$0xff]   ;;  %v2407_v5 = vld [vmem:[#allocation2 + $0x1f0] ss:$8 sps:$4 sm:$0xff]  }
  0x3e   :  { %847 = vmatprep.subr.bf16.mxu0 %v2332_v12  ;;  %v2412_v7 = vld [vmem:[#allocation2 + $0x204] ss:$8 sps:$4 sm:$0xff]   ;;  %v2410_v10 = vld [vmem:[#allocation2 + $0x200] ss:$8 sps:$4 sm:$0xff]   ;;  %v2415_v12 = vld [vmem:[#allocation2 + $0x214] ss:$8 sps:$4 sm:$0xff]  }
  0x3f   :  { %v54_v8 = vld [vmem:[%s2696_s0 + $0x28] sm:$0xff]  ;;  %v1003_v13 = vld [vmem:[#allocation5] sm:$0xff] }
  0x40   :  { %v62_v11 = vpack.c.bf16 %v54_v8, %v54_v8  ;;  %v1007_v14 = vld [vmem:[#allocation5 + $0x20] sm:$0xff] }
  0x41   :  { %848 = vmatpush1.bf16.msra.mxu0 %v2334_v15  ;;  %v1011_v15 = vld [vmem:[#allocation5 + $0x40] sm:$0xff] }
  0x42   :  { %849 = vmatprep.subr.bf16.mxu0 %v2335_v16  ;;  %v2413_v16 = vld [vmem:[#allocation2 + $0x210] ss:$8 sps:$4 sm:$0xff]   ;;  %v1039_v35 = vld [vmem:[#allocation5 + $0x120] sm:$0xff] }
  0x43   :  { %v1083_v6 = vld [vmem:[#allocation5 + $0x280] sm:$0xff] }
  0x45   :  { %850 = vmatpush1.bf16.msra.mxu0 %v2337_v17  ;;  %v2158_v17 = vcombine.high %v1003_v13, %v1007_v14 }
  0x46   :  { %851 = vmatprep.subr.bf16.mxu0 %v2338_v18  ;;  %v2157_v18 = vcombine.low %v1003_v13, %v1007_v14  ;;  %v1095_v13 = vld [vmem:[#allocation5 + $0x2e0] sm:$0xff] }
  0x47   :  { %1813 = vmatprep.subr.bf16.mxu1 %v2158_v17  ;;  %v2448_v17 = vld [vmem:[#allocation2 + $0x2c4] ss:$8 sps:$4 sm:$0xff]  }
  0x48   :  { %1814 = vmatpush1.bf16.msra.mxu1 %v2157_v18  ;;  %v1099_v18 = vld [vmem:[#allocation5 + $0x300] sm:$0xff] }
  0x49   :  { %852 = vmatpush1.bf16.msra.mxu0 %v2340_v19  ;;  %v1015_v19 = vld [vmem:[#allocation5 + $0x60] sm:$0xff] }
  0x4a   :  { %853 = vmatprep.subr.bf16.mxu0 %v2341_v20  ;;  %v2418_v20 = vld [vmem:[#allocation2 + $0x224] ss:$8 sps:$4 sm:$0xff]  }
  0x4d   :  { %854 = vmatpush1.bf16.msra.mxu0 %v2343_v21  ;;  %v2166_v21 = vcombine.high %v1011_v15, %v1015_v19 }
  0x4e   :  { %855 = vmatprep.subr.bf16.mxu0 %v2344_v22  ;;  %v1019_v22 = vld [vmem:[#allocation5 + $0x80] sm:$0xff] }
  0x4f   :  { %1815 = vmatprep.subr.bf16.mxu1 %v2166_v21  ;;  %v2446_v21 = vld [vmem:[#allocation2 + $0x2c0] ss:$8 sps:$4 sm:$0xff]  }
  0x51   :  { %856 = vmatpush1.bf16.msra.mxu0 %v2346_v23  ;;  %v1023_v23 = vld [vmem:[#allocation5 + $0xa0] sm:$0xff] }
  0x52   :  { %857 = vmatprep.subr.bf16.mxu0 %v2347_v24  ;;  %v2165_v24 = vcombine.low %v1011_v15, %v1015_v19  ;;  %v2443_v15 = vld [vmem:[#allocation2 + $0x2b0] ss:$8 sps:$4 sm:$0xff]   ;;  %v1103_v19 = vld [vmem:[#allocation5 + $0x320] sm:$0xff] }
  0x54   :  { %1816 = vmatpush1.bf16.msra.mxu1 %v2165_v24  ;;  %v1107_v24 = vld [vmem:[#allocation5 + $0x340] sm:$0xff] }
  0x55   :  { %858 = vmatpush1.bf16.msra.mxu0 %v2349_v25  ;;  %v2416_v25 = vld [vmem:[#allocation2 + $0x220] ss:$8 sps:$4 sm:$0xff]  }
  0x56   :  { %859 = vmatprep.subr.bf16.mxu0 %v2350_v26  ;;  %v2174_v26 = vcombine.high %v1019_v22, %v1023_v23 }
  0x58   :  { %1817 = vmatprep.subr.bf16.mxu1 %v2174_v26  ;;  %v2253_v26 = vcombine.low %v1099_v18, %v1103_v19 }
  0x59   :  { %860 = vmatpush1.bf16.msra.mxu0 %v2352_v27  ;;  %v2421_v27 = vld [vmem:[#allocation2 + $0x234] ss:$8 sps:$4 sm:$0xff]  }
  0x5a   :  { %861 = vmatprep.subr.bf16.mxu0 %v2353_v28  ;;  %v1027_v28 = vld [vmem:[#allocation5 + $0xc0] sm:$0xff] }
  0x5d   :  { %862 = vmatpush1.bf16.msra.mxu0 %v2355_v29  ;;  %v1031_v29 = vld [vmem:[#allocation5 + $0xe0] sm:$0xff] }
  0x5e   :  { %863 = vmatprep.subr.bf16.mxu0 %v2356_v30  ;;  %v2173_v30 = vcombine.low %v1019_v22, %v1023_v23  ;;  %v2181_v36 = vcombine.low %v1027_v28, %v1031_v29  ;;  %v2254_v22 = vcombine.high %v1099_v18, %v1103_v19  ;;  %v2451_v23 = vld [vmem:[#allocation2 + $0x2d4] ss:$8 sps:$4 sm:$0xff]  }
  0x60   :  { %1818 = vmatpush1.bf16.msra.mxu1 %v2173_v30 }
  0x61   :  { %864 = vmatpush1.bf16.msra.mxu0 %v2358_v31  ;;  %v2419_v31 = vld [vmem:[#allocation2 + $0x230] ss:$8 sps:$4 sm:$0xff]  }
  0x62   :  { %865 = vmatprep.subr.bf16.mxu0 %v2359_v32  ;;  %v2182_v32 = vcombine.high %v1027_v28, %v1031_v29  ;;  %v2454_v29 = vld [vmem:[#allocation2 + $0x2e4] ss:$8 sps:$4 sm:$0xff]  }
  0x64   :  { %1819 = vmatprep.subr.bf16.mxu1 %v2182_v32  ;;  %v2457_v32 = vld [vmem:[#allocation2 + $0x2f4] ss:$8 sps:$4 sm:$0xff]  }
  0x65   :  { %866 = vmatpush1.bf16.msra.mxu0 %v2361_v33  ;;  %v2424_v33 = vld [vmem:[#allocation2 + $0x244] ss:$8 sps:$4 sm:$0xff]   ;;  %1820 = vmatpush1.bf16.msra.mxu1 %v2181_v36  ;;  %v56_v36 = vld [vmem:[%s2696_s0 + $0x38] sm:$0xff] }
  0x66   :  { %876 = vmatprep.subr.bf16.mxu0 %v2364_v34  ;;  %v1035_v34 = vld [vmem:[#allocation5 + $0x100] sm:$0xff] }
  0x68   :  { %868 = vmatmul.mubr.bf16.vlgmr.msra.gmra.mrb[0].mxu0 %v57_v37  ;;  %v2422_v37 = vld [vmem:[#allocation2 + $0x240] ss:$8 sps:$4 sm:$0xff]  }
  0x69   :  { %877 = vmatpush1.bf16.msra.mxu0 %v2362_v38  ;;  %908 = vmatprep.mubr.bf16.mxu0 %v60_v39  ;;  %v2190_v38 = vcombine.high %v1035_v34, %v1039_v35  ;;  %v2427_v39 = vld [vmem:[#allocation2 + $0x254] ss:$8 sps:$4 sm:$0xff]  }
  0x6a   :  { %878 = vmatprep.subr.bf16.mxu0 %v2367_v40  ;;  %v1043_v40 = vld [vmem:[#allocation5 + $0x140] sm:$0xff] }
  0x6b   :  { %1821 = vmatprep.subr.bf16.mxu1 %v2190_v38  ;;  %v2458_v38 = vld [vmem:[#allocation2 + $0x300] ss:$8 sps:$4 sm:$0xff]  }
  0x6d   :  { %879 = vmatpush1.bf16.msra.mxu0 %v2365_v41  ;;  %v1047_v41 = vld [vmem:[#allocation5 + $0x160] sm:$0xff] }
  0x6e   :  { %880 = vmatprep.subr.bf16.mxu0 %v2370_v42  ;;  %v2189_v42 = vcombine.low %v1035_v34, %v1039_v35  ;;  %v53_v34 = vld [vmem:[%s2696_s0 + $0x20] sm:$0xff] }
  0x6f   :  { %v2460_v35 = vld [vmem:[#allocation2 + $0x304] ss:$8 sps:$4 sm:$0xff]  }
  0x70   :  { %1822 = vmatpush1.bf16.msra.mxu1 %v2189_v42  ;;  %v2466_v42 = vld [vmem:[#allocation2 + $0x324] ss:$8 sps:$4 sm:$0xff]  }
  0x71   :  { %881 = vmatpush1.bf16.msra.mxu0 %v2368_v43  ;;  %v2425_v43 = vld [vmem:[#allocation2 + $0x250] ss:$8 sps:$4 sm:$0xff]  }
  0x72   :  { %882 = vmatprep.subr.bf16.mxu0 %v2373_v44  ;;  %v2198_v44 = vcombine.high %v1043_v40, %v1047_v41 }
  0x74   :  { %1823 = vmatprep.subr.bf16.mxu1 %v2198_v44  ;;  %v2469_v44 = vld [vmem:[#allocation2 + $0x334] ss:$8 sps:$4 sm:$0xff]  }
  0x75   :  { %883 = vmatpush1.bf16.msra.mxu0 %v2371_v45  ;;  %v2430_v45 = vld [vmem:[#allocation2 + $0x264] ss:$8 sps:$4 sm:$0xff]  }
  0x76   :  { %884 = vmatprep.subr.bf16.mxu0 %v2376_v46  ;;  %v1051_v46 = vld [vmem:[#allocation5 + $0x180] sm:$0xff] }
  0x79   :  { %885 = vmatpush1.bf16.msra.mxu0 %v2374_v47  ;;  %v1055_v47 = vld [vmem:[#allocation5 + $0x1a0] sm:$0xff] }
  0x7a   :  { %886 = vmatprep.subr.bf16.mxu0 %v2379_v48  ;;  %v2197_v48 = vcombine.low %v1043_v40, %v1047_v41  ;;  %v2463_v40 = vld [vmem:[#allocation2 + $0x314] ss:$8 sps:$4 sm:$0xff]   ;;  %v2461_v41 = vld [vmem:[#allocation2 + $0x310] ss:$8 sps:$4 sm:$0xff]  }
  0x7c   :  { %1824 = vmatpush1.bf16.msra.mxu1 %v2197_v48  ;;  %v2475_v48 = vld [vmem:[#allocation2 + $0x354] ss:$8 sps:$4 sm:$0xff]  }
  0x7d   :  { %887 = vmatpush1.bf16.msra.mxu0 %v2377_v49  ;;  %v2428_v49 = vld [vmem:[#allocation2 + $0x260] ss:$8 sps:$4 sm:$0xff]  }
  0x7e   :  { %888 = vmatprep.subr.bf16.mxu0 %v2382_v50  ;;  %v2206_v50 = vcombine.high %v1051_v46, %v1055_v47 }
  0x80   :  { %1825 = vmatprep.subr.bf16.mxu1 %v2206_v50  ;;  %v2478_v50 = vld [vmem:[#allocation2 + $0x364] ss:$8 sps:$4 sm:$0xff]  }
  0x81   :  { %889 = vmatpush1.bf16.msra.mxu0 %v2380_v51  ;;  %v2433_v51 = vld [vmem:[#allocation2 + $0x274] ss:$8 sps:$4 sm:$0xff]  }
  0x82   :  { %890 = vmatprep.subr.bf16.mxu0 %v2385_v52  ;;  %v1059_v52 = vld [vmem:[#allocation5 + $0x1c0] sm:$0xff] }
  0x85   :  { %891 = vmatpush1.bf16.msra.mxu0 %v2383_v53  ;;  %v1063_v53 = vld [vmem:[#allocation5 + $0x1e0] sm:$0xff] }
  0x86   :  { %892 = vmatprep.subr.bf16.mxu0 %v2388_v54  ;;  %v2205_v54 = vcombine.low %v1051_v46, %v1055_v47  ;;  %v2472_v46 = vld [vmem:[#allocation2 + $0x344] ss:$8 sps:$4 sm:$0xff]   ;;  %v2470_v47 = vld [vmem:[#allocation2 + $0x340] ss:$8 sps:$4 sm:$0xff]  }
  0x88   :  { %1826 = vmatpush1.bf16.msra.mxu1 %v2205_v54  ;;  %v2484_v54 = vld [vmem:[#allocation2 + $0x384] ss:$8 sps:$4 sm:$0xff]  }
  0x89   :  { %893 = vmatpush1.bf16.msra.mxu0 %v2386_v55  ;;  %v2431_v55 = vld [vmem:[#allocation2 + $0x270] ss:$8 sps:$4 sm:$0xff]  }
  0x8a   :  { %894 = vmatprep.subr.bf16.mxu0 %v2391_v56  ;;  %v2214_v56 = vcombine.high %v1059_v52, %v1063_v53 }
  0x8c   :  { %1827 = vmatprep.subr.bf16.mxu1 %v2214_v56  ;;  %v2487_v56 = vld [vmem:[#allocation2 + $0x394] ss:$8 sps:$4 sm:$0xff]  }
  0x8d   :  { %895 = vmatpush1.bf16.msra.mxu0 %v2389_v57  ;;  %v2436_v57 = vld [vmem:[#allocation2 + $0x284] ss:$8 sps:$4 sm:$0xff]  }
  0x8e   :  { %896 = vmatprep.subr.bf16.mxu0 %v2394_v58  ;;  %v1067_v58 = vld [vmem:[#allocation5 + $0x200] sm:$0xff] }
  0x91   :  { %897 = vmatpush1.bf16.msra.mxu0 %v2392_v59  ;;  %v1071_v59 = vld [vmem:[#allocation5 + $0x220] sm:$0xff] }
  0x92   :  { %898 = vmatprep.subr.bf16.mxu0 %v2397_v60  ;;  %v2213_v60 = vcombine.low %v1059_v52, %v1063_v53  ;;  %v2481_v52 = vld [vmem:[#allocation2 + $0x374] ss:$8 sps:$4 sm:$0xff]   ;;  %v2479_v53 = vld [vmem:[#allocation2 + $0x370] ss:$8 sps:$4 sm:$0xff]  }
  0x94   :  { %1828 = vmatpush1.bf16.msra.mxu1 %v2213_v60  ;;  %v2493_v60 = vld [vmem:[#allocation2 + $0x3b4] ss:$8 sps:$4 sm:$0xff]  }
  0x95   :  { %899 = vmatpush1.bf16.msra.mxu0 %v2395_v61  ;;  %v2434_v61 = vld [vmem:[#allocation2 + $0x280] ss:$8 sps:$4 sm:$0xff]  }
  0x96   :  { %900 = vmatprep.subr.bf16.mxu0 %v2400_v62  ;;  %v2222_v62 = vcombine.high %v1067_v58, %v1071_v59 }
  0x98   :  { %1829 = vmatprep.subr.bf16.mxu1 %v2222_v62  ;;  %v2496_v62 = vld [vmem:[#allocation2 + $0x3c4] ss:$8 sps:$4 sm:$0xff]  }
  0x99   :  { %901 = vmatpush1.bf16.msra.mxu0 %v2398_v63  ;;  %v2439_v63 = vld [vmem:[#allocation2 + $0x294] ss:$8 sps:$4 sm:$0xff]  }
  0x9a   :  { %902 = vmatprep.subr.bf16.mxu0 %v2403_v0  ;;  %v1075_v0 = vld [vmem:[#allocation5 + $0x240] sm:$0xff] }
  0x9d   :  { %903 = vmatpush1.bf16.msra.mxu0 %v2401_v1  ;;  %v1079_v1 = vld [vmem:[#allocation5 + $0x260] sm:$0xff] }
  0x9e   :  { %904 = vmatprep.subr.bf16.mxu0 %v2406_v2  ;;  %v2221_v2 = vcombine.low %v1067_v58, %v1071_v59  ;;  %v2229_v8 = vcombine.low %v1075_v0, %v1079_v1  ;;  %v2490_v58 = vld [vmem:[#allocation2 + $0x3a4] ss:$8 sps:$4 sm:$0xff]   ;;  %v2488_v59 = vld [vmem:[#allocation2 + $0x3a0] ss:$8 sps:$4 sm:$0xff]  }
  0xa0   :  { %1830 = vmatpush1.bf16.msra.mxu1 %v2221_v2  ;;  %v2502_v2 = vld [vmem:[#allocation2 + $0x3e4] ss:$8 sps:$4 sm:$0xff]  }
  0xa1   :  { %905 = vmatpush1.bf16.msra.mxu0 %v2404_v3  ;;  %v2437_v3 = vld [vmem:[#allocation2 + $0x290] ss:$8 sps:$4 sm:$0xff]  }
  0xa2   :  { %906 = vmatprep.subr.bf16.mxu0 %v2409_v4  ;;  %v2230_v4 = vcombine.high %v1075_v0, %v1079_v1  ;;  %v2499_v0 = vld [vmem:[#allocation2 + $0x3d4] ss:$8 sps:$4 sm:$0xff]   ;;  %v2497_v1 = vld [vmem:[#allocation2 + $0x3d0] ss:$8 sps:$4 sm:$0xff]  }
  0xa4   :  { %1831 = vmatprep.subr.bf16.mxu1 %v2230_v4  ;;  %v2505_v4 = vld [vmem:[#allocation2 + $0x3f4] ss:$8 sps:$4 sm:$0xff]  }
  0xa5   :  { %907 = vmatpush1.bf16.msra.mxu0 %v2407_v5  ;;  %v2442_v5 = vld [vmem:[#allocation2 + $0x2a4] ss:$8 sps:$4 sm:$0xff]   ;;  %1832 = vmatpush1.bf16.msra.mxu1 %v2229_v8 }
  0xa6   :  { %917 = vmatprep.subr.bf16.mxu0 %v2412_v7  ;;  %v1087_v7 = vld [vmem:[#allocation5 + $0x2a0] sm:$0xff] }
  0xa7   :  { %v2237_v14 = vcombine.low %v1083_v6, %v1087_v7  ;;  %v1115_v8 = vld [vmem:[#allocation5 + $0x380] sm:$0xff] }
  0xa8   :  { %909 = vmatmul.mubr.bf16.vlgmr.msra.gmra.mrb[0].mxu0 %v59_v9  ;;  %v2440_v9 = vld [vmem:[#allocation2 + $0x2a0] ss:$8 sps:$4 sm:$0xff]  }
  0xa9   :  { %918 = vmatpush1.bf16.msra.mxu0 %v2410_v10  ;;  %949 = vmatprep.mubr.bf16.mxu0 %v62_v11  ;;  %v2238_v10 = vcombine.high %v1083_v6, %v1087_v7  ;;  %v2445_v11 = vld [vmem:[#allocation2 + $0x2b4] ss:$8 sps:$4 sm:$0xff]  }
  0xaa   :  { %919 = vmatprep.subr.bf16.mxu0 %v2415_v12  ;;  %v1091_v12 = vld [vmem:[#allocation5 + $0x2c0] sm:$0xff]  ;;  %v55_v6 = vld [vmem:[%s2696_s0 + $0x30] sm:$0xff] }
  0xab   :  { %1833 = vmatprep.subr.bf16.mxu1 %v2238_v10  ;;  %v63_v7 = vpack.c.bf16 %v55_v6, %v55_v6 }
  0xac   :  { %1834 = vmatpush1.bf16.msra.mxu1 %v2237_v14 }
  0xad   :  { %920 = vmatpush1.bf16.msra.mxu0 %v2413_v16  ;;  %v2246_v16 = vcombine.high %v1091_v12, %v1095_v13 }
  0xae   :  { %921 = vmatprep.subr.bf16.mxu0 %v2418_v20  ;;  %v2245_v20 = vcombine.low %v1091_v12, %v1095_v13  ;;  %v1123_v12 = vld [vmem:[#allocation5 + $0x3c0] sm:$0xff] }
  0xaf   :  { %1835 = vmatprep.subr.bf16.mxu1 %v2246_v16  ;;  %v1127_v13 = vld [vmem:[#allocation5 + $0x3e0] sm:$0xff]  ;;  %v1004_v16 = vld [vmem:[#allocation5 + $0x8] sm:$0xff] }
  0xb0   :  { %1836 = vmatpush1.bf16.msra.mxu1 %v2245_v20  ;;  %v2278_v14 = vcombine.high %v1123_v12, %v1127_v13  ;;  %v193_v20 = vld [vmem:[%s2697_s1] sm:$0xff] }
  0xb1   :  { %922 = vmatpush1.bf16.msra.mxu0 %v2416_v25  ;;  %v1111_v25 = vld [vmem:[#allocation5 + $0x360] sm:$0xff]  ;;  %1837 = vmatprep.subr.bf16.mxu1 %v2254_v22 }
  0xb2   :  { %923 = vmatprep.subr.bf16.mxu0 %v2421_v27  ;;  %v2449_v27 = vld [vmem:[#allocation2 + $0x2d0] ss:$8 sps:$4 sm:$0xff]   ;;  %v2262_v28 = vcombine.high %v1107_v24, %v1111_v25  ;;  %v2261_v30 = vcombine.low %v1107_v24, %v1111_v25 }
  0xb4   :  { %1838 = vmatpush1.bf16.msra.mxu1 %v2253_v26 }
  0xb5   :  { %924 = vmatpush1.bf16.msra.mxu0 %v2419_v31  ;;  %v2452_v31 = vld [vmem:[#allocation2 + $0x2e0] ss:$8 sps:$4 sm:$0xff]   ;;  %1839 = vmatprep.subr.bf16.mxu1 %v2262_v28 }
  0xb6   :  { %925 = vmatprep.subr.bf16.mxu0 %v2424_v33  ;;  %v2455_v33 = vld [vmem:[#allocation2 + $0x2f0] ss:$8 sps:$4 sm:$0xff]  }
  0xb8   :  { %1840 = vmatpush1.bf16.msra.mxu1 %v2261_v30  ;;  %v1012_v30 = vld [vmem:[#allocation5 + $0x48] sm:$0xff] }
  0xb9   :  { %926 = vmatpush1.bf16.msra.mxu0 %v2422_v37  ;;  %v61_v37 = vpack.c.bf16 %v53_v34, %v53_v34 }
  0xba   :  { %927 = vmatprep.subr.bf16.mxu0 %v2427_v39  ;;  %v64_v39 = vpack.c.bf16 %v56_v36, %v56_v36  ;;  %v1024_v36 = vld [vmem:[#allocation5 + $0xa8] sm:$0xff] }
  0xbd   :  { %928 = vmatpush1.bf16.msra.mxu0 %v2425_v43  ;;  %v2464_v43 = vld [vmem:[#allocation2 + $0x320] ss:$8 sps:$4 sm:$0xff]  }
  0xbe   :  { %929 = vmatprep.subr.bf16.mxu0 %v2430_v45  ;;  %v2467_v45 = vld [vmem:[#allocation2 + $0x330] ss:$8 sps:$4 sm:$0xff]  }
  0xc1   :  { %930 = vmatpush1.bf16.msra.mxu0 %v2428_v49  ;;  %v2473_v49 = vld [vmem:[#allocation2 + $0x350] ss:$8 sps:$4 sm:$0xff]  }
  0xc2   :  { %931 = vmatprep.subr.bf16.mxu0 %v2433_v51  ;;  %v2476_v51 = vld [vmem:[#allocation2 + $0x360] ss:$8 sps:$4 sm:$0xff]  }
  0xc5   :  { %932 = vmatpush1.bf16.msra.mxu0 %v2431_v55  ;;  %v2482_v55 = vld [vmem:[#allocation2 + $0x380] ss:$8 sps:$4 sm:$0xff]  }
  0xc6   :  { %933 = vmatprep.subr.bf16.mxu0 %v2436_v57  ;;  %v2485_v57 = vld [vmem:[#allocation2 + $0x390] ss:$8 sps:$4 sm:$0xff]  }
  0xc9   :  { %934 = vmatpush1.bf16.msra.mxu0 %v2434_v61  ;;  %v2491_v61 = vld [vmem:[#allocation2 + $0x3b0] ss:$8 sps:$4 sm:$0xff]  }
  0xca   :  { %935 = vmatprep.subr.bf16.mxu0 %v2439_v63  ;;  %v2494_v63 = vld [vmem:[#allocation2 + $0x3c0] ss:$8 sps:$4 sm:$0xff]  }
  0xcd   :  { %936 = vmatpush1.bf16.msra.mxu0 %v2437_v3  ;;  %v2500_v3 = vld [vmem:[#allocation2 + $0x3e0] ss:$8 sps:$4 sm:$0xff]  }
  0xce   :  { %937 = vmatprep.subr.bf16.mxu0 %v2442_v5  ;;  %v2503_v5 = vld [vmem:[#allocation2 + $0x3f0] ss:$8 sps:$4 sm:$0xff]  }
  0xd1   :  { %938 = vmatpush1.bf16.msra.mxu0 %v2440_v9  ;;  %v1119_v9 = vld [vmem:[#allocation5 + $0x3a0] sm:$0xff] }
  0xd2   :  { %939 = vmatprep.subr.bf16.mxu0 %v2445_v11  ;;  %v2270_v10 = vcombine.high %v1115_v8, %v1119_v9  ;;  %v2269_v11 = vcombine.low %v1115_v8, %v1119_v9  ;;  %v1096_v8 = vld [vmem:[#allocation5 + $0x2e8] sm:$0xff] }
  0xd4   :  { %1841 = vmatprep.subr.bf16.mxu1 %v2270_v10 }
  0xd5   :  { %940 = vmatpush1.bf16.msra.mxu0 %v2443_v15  ;;  %1842 = vmatpush1.bf16.msra.mxu1 %v2269_v11  ;;  %v2277_v15 = vcombine.low %v1123_v12, %v1127_v13  ;;  %v1100_v11 = vld [vmem:[#allocation5 + $0x308] sm:$0xff] }
  0xd6   :  { %941 = vmatprep.subr.bf16.mxu0 %v2448_v17  ;;  %1843 = vmatprep.subr.bf16.mxu1 %v2278_v14  ;;  %v1008_v17 = vld [vmem:[#allocation5 + $0x28] sm:$0xff] }
  0xd7   :  { %v2160_v18 = vcombine.high %v1004_v16, %v1008_v17  ;;  %v2159_v19 = vcombine.low %v1004_v16, %v1008_v17  ;;  %v1104_v12 = vld [vmem:[#allocation5 + $0x328] sm:$0xff] }
  0xd8   :  { %v2256_v14 = vcombine.high %v1100_v11, %v1104_v12  ;;  %v1112_v16 = vld [vmem:[#allocation5 + $0x368] sm:$0xff]  ;;  %v2255_v17 = vcombine.low %v1100_v11, %v1104_v12 }
  0xd9   :  { %942 = vmatpush1.bf16.msra.mxu0 %v2446_v21  ;;  %1844 = vmatpush1.bf16.msra.mxu1 %v2277_v15  ;;  %v194_v21 = vld [vmem:[%s2697_s1 + $0x8] sm:$0xff] }
  0xda   :  { %943 = vmatprep.subr.bf16.mxu0 %v2451_v23  ;;  %1854 = vmatprep.subr.bf16.mxu1 %v2160_v18  ;;  %v1108_v15 = vld [vmem:[#allocation5 + $0x348] sm:$0xff] }
  0xdb   :  { %v2264_v18 = vcombine.high %v1108_v15, %v1112_v16 }
  0xdd   :  { %944 = vmatpush1.bf16.msra.mxu0 %v2449_v27 }
  0xde   :  { %945 = vmatprep.subr.bf16.mxu0 %v2454_v29 }
  0xe1   :  { %946 = vmatpush1.bf16.msra.mxu0 %v2452_v31  ;;  %v1016_v31 = vld [vmem:[#allocation5 + $0x68] sm:$0xff] }
  0xe2   :  { %947 = vmatprep.subr.bf16.mxu0 %v2457_v32  ;;  %v2168_v34 = vcombine.high %v1012_v30, %v1016_v31 }
  0xe5   :  { %948 = vmatpush1.bf16.msra.mxu0 %v2455_v33 }
  0xe6   :  { %958 = vmatprep.subr.bf16.mxu0 %v2460_v35  ;;  %v1020_v35 = vld [vmem:[#allocation5 + $0x88] sm:$0xff] }
  0xe8   :  { %950 = vmatmul.mubr.bf16.vlgmr.msra.gmra.mrb[0].mxu0 %v61_v37  ;;  %v2167_v37 = vcombine.low %v1012_v30, %v1016_v31  ;;  %v1013_v31 = vld [vmem:[#allocation5 + $0x50] sm:$0xff] }
  0xe9   :  { %959 = vmatpush1.bf16.msra.mxu0 %v2458_v38  ;;  %990 = vmatprep.mubr.bf16.mxu0 %v64_v39  ;;  %v2176_v38 = vcombine.high %v1020_v35, %v1024_v36  ;;  %v1028_v39 = vld [vmem:[#allocation5 + $0xc8] sm:$0xff] }
  0xea   :  { %960 = vmatprep.subr.bf16.mxu0 %v2463_v40  ;;  %v1032_v40 = vld [vmem:[#allocation5 + $0xe8] sm:$0xff] }
  0xed   :  { %961 = vmatpush1.bf16.msra.mxu0 %v2461_v41  ;;  %v2175_v41 = vcombine.low %v1020_v35, %v1024_v36 }
  0xee   :  { %962 = vmatprep.subr.bf16.mxu0 %v2466_v42  ;;  %v2184_v42 = vcombine.high %v1028_v39, %v1032_v40 }
  0xf1   :  { %963 = vmatpush1.bf16.msra.mxu0 %v2464_v43  ;;  %v1036_v43 = vld [vmem:[#allocation5 + $0x108] sm:$0xff] }
  0xf2   :  { %964 = vmatprep.subr.bf16.mxu0 %v2469_v44  ;;  %v1040_v44 = vld [vmem:[#allocation5 + $0x128] sm:$0xff] }
  0xf5   :  { %965 = vmatpush1.bf16.msra.mxu0 %v2467_v45  ;;  %v2183_v45 = vcombine.low %v1028_v39, %v1032_v40 }
  0xf6   :  { %966 = vmatprep.subr.bf16.mxu0 %v2472_v46  ;;  %v2192_v46 = vcombine.high %v1036_v43, %v1040_v44 }
  0xf9   :  { %967 = vmatpush1.bf16.msra.mxu0 %v2470_v47  ;;  %v1044_v47 = vld [vmem:[#allocation5 + $0x148] sm:$0xff] }
  0xfa   :  { %968 = vmatprep.subr.bf16.mxu0 %v2475_v48  ;;  %v1048_v48 = vld [vmem:[#allocation5 + $0x168] sm:$0xff] }
  0xfd   :  { %969 = vmatpush1.bf16.msra.mxu0 %v2473_v49  ;;  %v2191_v49 = vcombine.low %v1036_v43, %v1040_v44 }
  0xfe   :  { %970 = vmatprep.subr.bf16.mxu0 %v2478_v50  ;;  %v2200_v50 = vcombine.high %v1044_v47, %v1048_v48 }
 0x101   :  { %971 = vmatpush1.bf16.msra.mxu0 %v2476_v51  ;;  %v1052_v51 = vld [vmem:[#allocation5 + $0x188] sm:$0xff] }
 0x102   :  { %972 = vmatprep.subr.bf16.mxu0 %v2481_v52  ;;  %v1056_v52 = vld [vmem:[#allocation5 + $0x1a8] sm:$0xff] }
 0x105   :  { %973 = vmatpush1.bf16.msra.mxu0 %v2479_v53  ;;  %v2199_v53 = vcombine.low %v1044_v47, %v1048_v48 }
 0x106   :  { %974 = vmatprep.subr.bf16.mxu0 %v2484_v54  ;;  %v2208_v54 = vcombine.high %v1052_v51, %v1056_v52 }
 0x109   :  { %975 = vmatpush1.bf16.msra.mxu0 %v2482_v55  ;;  %v1060_v55 = vld [vmem:[#allocation5 + $0x1c8] sm:$0xff] }
 0x10a   :  { %976 = vmatprep.subr.bf16.mxu0 %v2487_v56  ;;  %v1064_v56 = vld [vmem:[#allocation5 + $0x1e8] sm:$0xff] }
 0x10d   :  { %977 = vmatpush1.bf16.msra.mxu0 %v2485_v57  ;;  %v2207_v57 = vcombine.low %v1052_v51, %v1056_v52 }
 0x10e   :  { %978 = vmatprep.subr.bf16.mxu0 %v2490_v58  ;;  %v2216_v58 = vcombine.high %v1060_v55, %v1064_v56 }
 0x111   :  { %979 = vmatpush1.bf16.msra.mxu0 %v2488_v59  ;;  %v1068_v59 = vld [vmem:[#allocation5 + $0x208] sm:$0xff] }
 0x112   :  { %980 = vmatprep.subr.bf16.mxu0 %v2493_v60  ;;  %v1072_v60 = vld [vmem:[#allocation5 + $0x228] sm:$0xff] }
 0x115   :  { %981 = vmatpush1.bf16.msra.mxu0 %v2491_v61  ;;  %v2215_v61 = vcombine.low %v1060_v55, %v1064_v56 }
 0x116   :  { %982 = vmatprep.subr.bf16.mxu0 %v2496_v62  ;;  %v2224_v62 = vcombine.high %v1068_v59, %v1072_v60 }
 0x119   :  { %983 = vmatpush1.bf16.msra.mxu0 %v2494_v63  ;;  %v1076_v63 = vld [vmem:[#allocation5 + $0x248] sm:$0xff] }
 0x11a   :  { %984 = vmatprep.subr.bf16.mxu0 %v2499_v0  ;;  %v1080_v0 = vld [vmem:[#allocation5 + $0x268] sm:$0xff] }
 0x11d   :  { %985 = vmatpush1.bf16.msra.mxu0 %v2497_v1  ;;  %v2223_v1 = vcombine.low %v1068_v59, %v1072_v60 }
 0x11e   :  { %986 = vmatprep.subr.bf16.mxu0 %v2502_v2  ;;  %v2232_v2 = vcombine.high %v1076_v63, %v1080_v0 }
 0x121   :  { %987 = vmatpush1.bf16.msra.mxu0 %v2500_v3  ;;  %v1084_v3 = vld [vmem:[#allocation5 + $0x288] sm:$0xff] }
 0x122   :  { %988 = vmatprep.subr.bf16.mxu0 %v2505_v4  ;;  %v1088_v4 = vld [vmem:[#allocation5 + $0x2a8] sm:$0xff] }
 0x123   :  { %v2240_v6 = vcombine.high %v1084_v3, %v1088_v4  ;;  %v2239_v9 = vcombine.low %v1084_v3, %v1088_v4 }
 0x125   :  { %989 = vmatpush1.bf16.msra.mxu0 %v2503_v5  ;;  %v2231_v5 = vcombine.low %v1076_v63, %v1080_v0 }
 0x128   :  { %991 = vmatmul.mubr.bf16.vlgmr.msra.gmra.mrb[0].mxu0 %v63_v7  ;;  %v1092_v7 = vld [vmem:[#allocation5 + $0x2c8] sm:$0xff] }
 0x129   :  { %v2248_v10 = vcombine.high %v1092_v7, %v1096_v8  ;;  %v2247_v13 = vcombine.low %v1092_v7, %v1096_v8 }
 0x1fb   :  { %v992_v22 = vpop.f32.mrb[0].mxu0 }
 0x1fc   :  { %v2293_v23 = vadd.f32 %v992_v22, %v193_v20  ;;  %v994_v24 = vpop.f32.mrb[1].mxu0  ;;  %v1120_v20 = vld [vmem:[#allocation5 + $0x3a8] sm:$0xff] }
 0x1fd   :  { %v2294_v25 = vadd.f32 %v994_v24, %v194_v21  ;;  %v996_v26 = vpop.f32.mrb[2].mxu0  ;;  %v2263_v21 = vcombine.low %v1108_v15, %v1112_v16  ;;  %v1128_v24 = vld [vmem:[#allocation5 + $0x3e8] sm:$0xff] }
 0x1fe   :  { %v999_v27 = vmax.f32 %v2293_v23, 0.0  ;;  %v997_v28 = vpop.f32.mrb[3].mxu0  ;;  %v1124_v23 = vld [vmem:[#allocation5 + $0x3c8] sm:$0xff] }
 0x1ff   :  { %v1000_v29 = vmax.f32 %v2294_v25, 0.0  ;;  %v2280_v26 = vcombine.high %v1124_v23, %v1128_v24  ;;  %v1009_v28 = vld [vmem:[#allocation5 + $0x30] sm:$0xff] }
 0x200   :  { %v2671_v33 = vpack.c.bf16 %v999_v27, %v999_v27  ;;  %v1005_v27 = vld [vmem:[#allocation5 + $0x10] sm:$0xff] }
 0x201   :  { %v2669_v32 = vpack.c.bf16 %v1000_v29, %v1000_v29  ;;  %v2279_v29 = vcombine.low %v1124_v23, %v1128_v24  ;;  %v2162_v30 = vcombine.high %v1005_v27, %v1009_v28  ;;  %v2161_v35 = vcombine.low %v1005_v27, %v1009_v28 }
 0x203   :  { %1845 = vmatprep.mubr.bf16.mxu1 %v2669_v32 }
 0x204   :  { %1846 = vmatmul.mubr.bf16.vlgmr.msra.gmra.mrb[0].mxu1 %v2671_v33 }
 0x205   :  { %1855 = vmatpush1.bf16.msra.mxu1 %v2159_v19  ;;  %1886 = vmatprep.mubr.bf16.mxu1 %v2669_v32  ;;  %v1116_v19 = vld [vmem:[#allocation5 + $0x388] sm:$0xff] }
 0x206   :  { %1856 = vmatprep.subr.bf16.mxu1 %v2168_v34  ;;  %v2272_v22 = vcombine.high %v1116_v19, %v1120_v20  ;;  %v2271_v25 = vcombine.low %v1116_v19, %v1120_v20  ;;  %v1017_v34 = vld [vmem:[#allocation5 + $0x70] sm:$0xff] }
 0x207   :  { %v2170_v36 = vcombine.high %v1013_v31, %v1017_v34  ;;  %v2169_v39 = vcombine.low %v1013_v31, %v1017_v34 }
 0x209   :  { %1857 = vmatpush1.bf16.msra.mxu1 %v2167_v37  ;;  %v1021_v37 = vld [vmem:[#allocation5 + $0x90] sm:$0xff] }
 0x20a   :  { %1858 = vmatprep.subr.bf16.mxu1 %v2176_v38  ;;  %v1025_v38 = vld [vmem:[#allocation5 + $0xb0] sm:$0xff] }
 0x20b   :  { %v2178_v40 = vcombine.high %v1021_v37, %v1025_v38  ;;  %v2177_v43 = vcombine.low %v1021_v37, %v1025_v38 }
 0x20d   :  { %1859 = vmatpush1.bf16.msra.mxu1 %v2175_v41  ;;  %v1029_v41 = vld [vmem:[#allocation5 + $0xd0] sm:$0xff] }
 0x20e   :  { %1860 = vmatprep.subr.bf16.mxu1 %v2184_v42  ;;  %v1033_v42 = vld [vmem:[#allocation5 + $0xf0] sm:$0xff] }
 0x20f   :  { %v2186_v44 = vcombine.high %v1029_v41, %v1033_v42  ;;  %v2185_v47 = vcombine.low %v1029_v41, %v1033_v42 }
 0x211   :  { %1861 = vmatpush1.bf16.msra.mxu1 %v2183_v45  ;;  %v1037_v45 = vld [vmem:[#allocation5 + $0x110] sm:$0xff] }
 0x212   :  { %1862 = vmatprep.subr.bf16.mxu1 %v2192_v46  ;;  %v1041_v46 = vld [vmem:[#allocation5 + $0x130] sm:$0xff] }
 0x213   :  { %v2194_v48 = vcombine.high %v1037_v45, %v1041_v46  ;;  %v2193_v51 = vcombine.low %v1037_v45, %v1041_v46 }
 0x215   :  { %1863 = vmatpush1.bf16.msra.mxu1 %v2191_v49  ;;  %v1045_v49 = vld [vmem:[#allocation5 + $0x150] sm:$0xff] }
 0x216   :  { %1864 = vmatprep.subr.bf16.mxu1 %v2200_v50  ;;  %v1049_v50 = vld [vmem:[#allocation5 + $0x170] sm:$0xff] }
 0x217   :  { %v2202_v52 = vcombine.high %v1045_v49, %v1049_v50  ;;  %v2201_v55 = vcombine.low %v1045_v49, %v1049_v50 }
 0x219   :  { %1865 = vmatpush1.bf16.msra.mxu1 %v2199_v53  ;;  %v1053_v53 = vld [vmem:[#allocation5 + $0x190] sm:$0xff] }
 0x21a   :  { %1866 = vmatprep.subr.bf16.mxu1 %v2208_v54  ;;  %v1057_v54 = vld [vmem:[#allocation5 + $0x1b0] sm:$0xff] }
 0x21b   :  { %v2210_v56 = vcombine.high %v1053_v53, %v1057_v54  ;;  %v2209_v59 = vcombine.low %v1053_v53, %v1057_v54  ;;  %v1054_v54 = vld [vmem:[#allocation5 + $0x198] sm:$0xff] }
 0x21d   :  { %1867 = vmatpush1.bf16.msra.mxu1 %v2207_v57  ;;  %v1061_v57 = vld [vmem:[#allocation5 + $0x1d0] sm:$0xff] }
 0x21e   :  { %1868 = vmatprep.subr.bf16.mxu1 %v2216_v58  ;;  %v1065_v58 = vld [vmem:[#allocation5 + $0x1f0] sm:$0xff] }
 0x21f   :  { %v2218_v60 = vcombine.high %v1061_v57, %v1065_v58  ;;  %v2217_v63 = vcombine.low %v1061_v57, %v1065_v58  ;;  %v1062_v58 = vld [vmem:[#allocation5 + $0x1d8] sm:$0xff] }
 0x221   :  { %1869 = vmatpush1.bf16.msra.mxu1 %v2215_v61  ;;  %v1069_v61 = vld [vmem:[#allocation5 + $0x210] sm:$0xff] }
 0x222   :  { %1870 = vmatprep.subr.bf16.mxu1 %v2224_v62  ;;  %v1073_v62 = vld [vmem:[#allocation5 + $0x230] sm:$0xff] }
 0x223   :  { %v2226_v0 = vcombine.high %v1069_v61, %v1073_v62  ;;  %v2225_v3 = vcombine.low %v1069_v61, %v1073_v62  ;;  %v1070_v62 = vld [vmem:[#allocation5 + $0x218] sm:$0xff] }
 0x225   :  { %1871 = vmatpush1.bf16.msra.mxu1 %v2223_v1  ;;  %v1077_v1 = vld [vmem:[#allocation5 + $0x250] sm:$0xff] }
 0x226   :  { %1872 = vmatprep.subr.bf16.mxu1 %v2232_v2  ;;  %v1081_v2 = vld [vmem:[#allocation5 + $0x270] sm:$0xff] }
 0x227   :  { %v2234_v4 = vcombine.high %v1077_v1, %v1081_v2  ;;  %v2233_v7 = vcombine.low %v1077_v1, %v1081_v2  ;;  %v1078_v2 = vld [vmem:[#allocation5 + $0x258] sm:$0xff] }
 0x229   :  { %1873 = vmatpush1.bf16.msra.mxu1 %v2231_v5  ;;  %v1085_v5 = vld [vmem:[#allocation5 + $0x290] sm:$0xff] }
 0x22a   :  { %1874 = vmatprep.subr.bf16.mxu1 %v2240_v6  ;;  %v1089_v6 = vld [vmem:[#allocation5 + $0x2b0] sm:$0xff] }
 0x22b   :  { %v2242_v8 = vcombine.high %v1085_v5, %v1089_v6  ;;  %v2241_v11 = vcombine.low %v1085_v5, %v1089_v6  ;;  %v1086_v6 = vld [vmem:[#allocation5 + $0x298] sm:$0xff] }
 0x22d   :  { %1875 = vmatpush1.bf16.msra.mxu1 %v2239_v9  ;;  %v1093_v9 = vld [vmem:[#allocation5 + $0x2d0] sm:$0xff] }
 0x22e   :  { %1876 = vmatprep.subr.bf16.mxu1 %v2248_v10  ;;  %v1097_v10 = vld [vmem:[#allocation5 + $0x2f0] sm:$0xff] }
 0x22f   :  { %v2250_v12 = vcombine.high %v1093_v9, %v1097_v10  ;;  %v2249_v15 = vcombine.low %v1093_v9, %v1097_v10  ;;  %v1094_v10 = vld [vmem:[#allocation5 + $0x2d8] sm:$0xff] }
 0x231   :  { %1877 = vmatpush1.bf16.msra.mxu1 %v2247_v13  ;;  %v1101_v13 = vld [vmem:[#allocation5 + $0x310] sm:$0xff] }
 0x232   :  { %1878 = vmatprep.subr.bf16.mxu1 %v2256_v14  ;;  %v1105_v14 = vld [vmem:[#allocation5 + $0x330] sm:$0xff] }
 0x233   :  { %v2258_v16 = vcombine.high %v1101_v13, %v1105_v14  ;;  %v2257_v19 = vcombine.low %v1101_v13, %v1105_v14  ;;  %v1102_v14 = vld [vmem:[#allocation5 + $0x318] sm:$0xff] }
 0x235   :  { %1879 = vmatpush1.bf16.msra.mxu1 %v2255_v17  ;;  %v1109_v17 = vld [vmem:[#allocation5 + $0x350] sm:$0xff] }
 0x236   :  { %1880 = vmatprep.subr.bf16.mxu1 %v2264_v18  ;;  %v1113_v18 = vld [vmem:[#allocation5 + $0x370] sm:$0xff] }
 0x237   :  { %v2266_v20 = vcombine.high %v1109_v17, %v1113_v18  ;;  %v2265_v23 = vcombine.low %v1109_v17, %v1113_v18  ;;  %v1110_v18 = vld [vmem:[#allocation5 + $0x358] sm:$0xff] }
 0x239   :  { %1881 = vmatpush1.bf16.msra.mxu1 %v2263_v21  ;;  %v1117_v21 = vld [vmem:[#allocation5 + $0x390] sm:$0xff] }
 0x23a   :  { %1882 = vmatprep.subr.bf16.mxu1 %v2272_v22  ;;  %v1121_v22 = vld [vmem:[#allocation5 + $0x3b0] sm:$0xff] }
 0x23b   :  { %v2274_v24 = vcombine.high %v1117_v21, %v1121_v22  ;;  %v2273_v27 = vcombine.low %v1117_v21, %v1121_v22  ;;  %v1118_v22 = vld [vmem:[#allocation5 + $0x398] sm:$0xff] }
 0x23d   :  { %1883 = vmatpush1.bf16.msra.mxu1 %v2271_v25  ;;  %v1125_v25 = vld [vmem:[#allocation5 + $0x3d0] sm:$0xff] }
 0x23e   :  { %1884 = vmatprep.subr.bf16.mxu1 %v2280_v26  ;;  %v1129_v26 = vld [vmem:[#allocation5 + $0x3f0] sm:$0xff] }
 0x23f   :  { %v2282_v28 = vcombine.high %v1125_v25, %v1129_v26  ;;  %v2281_v31 = vcombine.low %v1125_v25, %v1129_v26  ;;  %v1126_v26 = vld [vmem:[#allocation5 + $0x3d8] sm:$0xff] }
 0x241   :  { %1885 = vmatpush1.bf16.msra.mxu1 %v2279_v29  ;;  %v1006_v29 = vld [vmem:[#allocation5 + $0x18] sm:$0xff] }
 0x242   :  { %1895 = vmatprep.subr.bf16.mxu1 %v2162_v30  ;;  %v1010_v30 = vld [vmem:[#allocation5 + $0x38] sm:$0xff] }
 0x243   :  { %v2164_v34 = vcombine.high %v1006_v29, %v1010_v30  ;;  %v2163_v37 = vcombine.low %v1006_v29, %v1010_v30 }
 0x244   :  { %1887 = vmatmul.mubr.bf16.vlgmr.msra.gmra.mrb[4].mxu1 %v2671_v33 }
 0x245   :  { %1896 = vmatpush1.bf16.msra.mxu1 %v2161_v35  ;;  %1927 = vmatprep.mubr.bf16.mxu1 %v2669_v32  ;;  %v1014_v35 = vld [vmem:[#allocation5 + $0x58] sm:$0xff] }
 0x246   :  { %1897 = vmatprep.subr.bf16.mxu1 %v2170_v36  ;;  %v1018_v36 = vld [vmem:[#allocation5 + $0x78] sm:$0xff] }
 0x247   :  { %v2172_v38 = vcombine.high %v1014_v35, %v1018_v36  ;;  %v2171_v41 = vcombine.low %v1014_v35, %v1018_v36  ;;  %v1131_v36 = vld [vmem:[%s2700_s4] sm:$0xff]  ;;  %s2584_s4 = smov [#allocation7]  }
 0x248   :  { %s2019_s14 = sshll.u32 %s2584_s4, 4  ;;  %s2020_s14 = int_to_ptr.vmem [resolvable:$true] %s2019_s14 }
 0x249   :  { %1898 = vmatpush1.bf16.msra.mxu1 %v2169_v39  ;;  %v1022_v39 = vld [vmem:[#allocation5 + $0x98] sm:$0xff]  ;;  %s2550_s15 = scalar_lea.vmem %s2020_s14, 512  ;;  %p2555_p3 = scmp.lt.s32.totalorder %s2020_s14, %s2020_s14 }
 0x24a   :  { %1899 = vmatprep.subr.bf16.mxu1 %v2178_v40  ;;  %v1026_v40 = vld [vmem:[#allocation5 + $0xb8] sm:$0xff]  ;;  %p2551_p2 = scmp.ne.s32.totalorder %s2020_s14, %s2550_s15  ;;  %p2556_p4 = scmp.lt.s32.totalorder %s2550_s15, %s2550_s15 }
 0x24b   :  { %v2180_v42 = vcombine.high %v1022_v39, %v1026_v40  ;;  %v2179_v45 = vcombine.low %v1022_v39, %v1026_v40 }
 0x24c   :  { %p2557_p5 = por %p2556_p4, %p2555_p3 }
 0x24d   :  { %1900 = vmatpush1.bf16.msra.mxu1 %v2177_v43  ;;  %v1030_v43 = vld [vmem:[#allocation5 + $0xd8] sm:$0xff] }
 0x24e   :  { %1901 = vmatprep.subr.bf16.mxu1 %v2186_v44  ;;  %v1034_v44 = vld [vmem:[#allocation5 + $0xf8] sm:$0xff]  ;;  %p2558_p6 = pnand %p2557_p5, %p2551_p2 }
 0x24f   :  { %v2188_v46 = vcombine.high %v1030_v43, %v1034_v44  ;;  %v2187_v49 = vcombine.low %v1030_v43, %v1034_v44 }
 0x251   :  { %1902 = vmatpush1.bf16.msra.mxu1 %v2185_v47  ;;  %v1038_v47 = vld [vmem:[#allocation5 + $0x118] sm:$0xff] }
 0x252   :  { %1903 = vmatprep.subr.bf16.mxu1 %v2194_v48  ;;  %v1042_v48 = vld [vmem:[#allocation5 + $0x138] sm:$0xff] }
 0x253   :  { %v2196_v50 = vcombine.high %v1038_v47, %v1042_v48  ;;  %v2195_v53 = vcombine.low %v1038_v47, %v1042_v48 }
 0x255   :  { %1904 = vmatpush1.bf16.msra.mxu1 %v2193_v51  ;;  %v1046_v51 = vld [vmem:[#allocation5 + $0x158] sm:$0xff] }
 0x256   :  { %1905 = vmatprep.subr.bf16.mxu1 %v2202_v52  ;;  %v1050_v52 = vld [vmem:[#allocation5 + $0x178] sm:$0xff] }
 0x259   :  { %1906 = vmatpush1.bf16.msra.mxu1 %v2201_v55  ;;  %v1058_v55 = vld [vmem:[#allocation5 + $0x1b8] sm:$0xff] }
 0x25a   :  { %1907 = vmatprep.subr.bf16.mxu1 %v2210_v56  ;;  %v2203_v56 = vcombine.low %v1046_v51, %v1050_v52  ;;  %v2212_v57 = vcombine.high %v1054_v54, %v1058_v55 }
 0x25d   :  { %1908 = vmatpush1.bf16.msra.mxu1 %v2209_v59  ;;  %v1066_v59 = vld [vmem:[#allocation5 + $0x1f8] sm:$0xff] }
 0x25e   :  { %1909 = vmatprep.subr.bf16.mxu1 %v2218_v60  ;;  %v2211_v60 = vcombine.low %v1054_v54, %v1058_v55  ;;  %v2220_v61 = vcombine.high %v1062_v58, %v1066_v59 }
 0x261   :  { %1910 = vmatpush1.bf16.msra.mxu1 %v2217_v63  ;;  %v1074_v63 = vld [vmem:[#allocation5 + $0x238] sm:$0xff] }
 0x262   :  { %1911 = vmatprep.subr.bf16.mxu1 %v2226_v0  ;;  %v2219_v0 = vcombine.low %v1062_v58, %v1066_v59  ;;  %v2228_v1 = vcombine.high %v1070_v62, %v1074_v63 }
 0x265   :  { %1912 = vmatpush1.bf16.msra.mxu1 %v2225_v3  ;;  %v1082_v3 = vld [vmem:[#allocation5 + $0x278] sm:$0xff] }
 0x266   :  { %1913 = vmatprep.subr.bf16.mxu1 %v2234_v4  ;;  %v2227_v4 = vcombine.low %v1070_v62, %v1074_v63  ;;  %v2236_v5 = vcombine.high %v1078_v2, %v1082_v3 }
 0x269   :  { %1914 = vmatpush1.bf16.msra.mxu1 %v2233_v7  ;;  %v1090_v7 = vld [vmem:[#allocation5 + $0x2b8] sm:$0xff] }
 0x26a   :  { %1915 = vmatprep.subr.bf16.mxu1 %v2242_v8  ;;  %v2235_v8 = vcombine.low %v1078_v2, %v1082_v3  ;;  %v2244_v9 = vcombine.high %v1086_v6, %v1090_v7 }
 0x26d   :  { %1916 = vmatpush1.bf16.msra.mxu1 %v2241_v11  ;;  %v1098_v11 = vld [vmem:[#allocation5 + $0x2f8] sm:$0xff] }
 0x26e   :  { %1917 = vmatprep.subr.bf16.mxu1 %v2250_v12  ;;  %v2243_v12 = vcombine.low %v1086_v6, %v1090_v7  ;;  %v2252_v13 = vcombine.high %v1094_v10, %v1098_v11 }
 0x271   :  { %1918 = vmatpush1.bf16.msra.mxu1 %v2249_v15  ;;  %v1106_v15 = vld [vmem:[#allocation5 + $0x338] sm:$0xff] }
 0x272   :  { %1919 = vmatprep.subr.bf16.mxu1 %v2258_v16  ;;  %v2251_v16 = vcombine.low %v1094_v10, %v1098_v11  ;;  %v2260_v17 = vcombine.high %v1102_v14, %v1106_v15 }
 0x275   :  { %1920 = vmatpush1.bf16.msra.mxu1 %v2257_v19  ;;  %v1114_v19 = vld [vmem:[#allocation5 + $0x378] sm:$0xff] }
 0x276   :  { %1921 = vmatprep.subr.bf16.mxu1 %v2266_v20  ;;  %v2259_v20 = vcombine.low %v1102_v14, %v1106_v15  ;;  %v2268_v21 = vcombine.high %v1110_v18, %v1114_v19 }
 0x279   :  { %1922 = vmatpush1.bf16.msra.mxu1 %v2265_v23  ;;  %v1122_v23 = vld [vmem:[#allocation5 + $0x3b8] sm:$0xff] }
 0x27a   :  { %1923 = vmatprep.subr.bf16.mxu1 %v2274_v24  ;;  %v2267_v24 = vcombine.low %v1110_v18, %v1114_v19  ;;  %v2276_v25 = vcombine.high %v1118_v22, %v1122_v23 }
 0x27d   :  { %1924 = vmatpush1.bf16.msra.mxu1 %v2273_v27  ;;  %v1130_v27 = vld [vmem:[#allocation5 + $0x3f8] sm:$0xff] }
 0x27e   :  { %1925 = vmatprep.subr.bf16.mxu1 %v2282_v28  ;;  %v2275_v28 = vcombine.low %v1118_v22, %v1122_v23  ;;  %v2284_v29 = vcombine.high %v1126_v26, %v1130_v27  ;;  %v2283_v30 = vcombine.low %v1126_v26, %v1130_v27 }
 0x281   :  { %1926 = vmatpush1.bf16.msra.mxu1 %v2281_v31  ;;  %v1133_v31 = vlaneseq }
 0x282   :  { %1936 = vmatprep.subr.bf16.mxu1 %v2164_v34 }
 0x283   :  { %v1134_v34 = vshrl.u32 %v1133_v31, 7 }
 0x284   :  { %1928 = vmatmul.mubr.bf16.vlgmr.msra.gmra.mrb[8].mxu1 %v2671_v33 }
 0x285   :  { %1937 = vmatpush1.bf16.msra.mxu1 %v2163_v37  ;;  %1968 = vmatprep.mubr.bf16.mxu1 %v2669_v32  ;;  %v2204_v32 = vcombine.high %v1046_v51, %v1050_v52  ;;  %v1135_v35 = vsub.s32 0, %v1134_v34  ;;  %v1139_v37 = vsub.s32 1, %v1134_v34  ;;  %v1143_v47 = vsub.s32 2, %v1134_v34 }
 0x286   :  { %1938 = vmatprep.subr.bf16.mxu1 %v2172_v38  ;;  %v1159_v3 = vsub.s32 6, %v1134_v34 }
 0x287   :  { %v1136_v38 = vrot.slane %v1131_v36, %v1135_v35  ;;  %v1140_v39 = vrot.slane %v1131_v36, %v1139_v37  ;;  %v1144_v48 = vrot.slane %v1131_v36, %v1143_v47 }
 0x289   :  { %1939 = vmatpush1.bf16.msra.mxu1 %v2171_v41 }
 0x28a   :  { %1940 = vmatprep.subr.bf16.mxu1 %v2180_v42 }
 0x28d   :  { %1941 = vmatpush1.bf16.msra.mxu1 %v2179_v45 }
 0x28e   :  { %1942 = vmatprep.subr.bf16.mxu1 %v2188_v46 }
 0x291   :  { %1943 = vmatpush1.bf16.msra.mxu1 %v2187_v49 }
 0x292   :  { %1944 = vmatprep.subr.bf16.mxu1 %v2196_v50 }
 0x295   :  { %1945 = vmatpush1.bf16.msra.mxu1 %v2195_v53 }
 0x296   :  { %1946 = vmatprep.subr.bf16.mxu1 %v2204_v32 }
 0x299   :  { %1947 = vmatpush1.bf16.msra.mxu1 %v2203_v56  ;;  %v1151_v56 = vsub.s32 4, %v1134_v34 }
 0x29a   :  { %1948 = vmatprep.subr.bf16.mxu1 %v2212_v57  ;;  %v1155_v57 = vsub.s32 5, %v1134_v34 }
 0x29b   :  { %v1152_v58 = vrot.slane %v1131_v36, %v1151_v56 }
 0x29c   :  { %v1156_v59 = vrot.slane %v1131_v36, %v1155_v57 }
 0x29d   :  { %1949 = vmatpush1.bf16.msra.mxu1 %v2211_v60 }
 0x29e   :  { %1950 = vmatprep.subr.bf16.mxu1 %v2220_v61 }
 0x2a1   :  { %1951 = vmatpush1.bf16.msra.mxu1 %v2219_v0 }
 0x2a2   :  { %1952 = vmatprep.subr.bf16.mxu1 %v2228_v1 }
 0x2a5   :  { %1953 = vmatpush1.bf16.msra.mxu1 %v2227_v4  ;;  %v1163_v4 = vsub.s32 7, %v1134_v34 }
 0x2a6   :  { %1954 = vmatprep.subr.bf16.mxu1 %v2236_v5  ;;  %v1160_v5 = vrot.slane %v1131_v36, %v1159_v3 }
 0x2a7   :  { %v1164_v6 = vrot.slane %v1131_v36, %v1163_v4 }
 0x2a9   :  { %1955 = vmatpush1.bf16.msra.mxu1 %v2235_v8 }
 0x2aa   :  { %1956 = vmatprep.subr.bf16.mxu1 %v2244_v9 }
 0x2ad   :  { %1957 = vmatpush1.bf16.msra.mxu1 %v2243_v12 }
 0x2ae   :  { %1958 = vmatprep.subr.bf16.mxu1 %v2252_v13 }
 0x2b1   :  { %1959 = vmatpush1.bf16.msra.mxu1 %v2251_v16 }
 0x2b2   :  { %1960 = vmatprep.subr.bf16.mxu1 %v2260_v17 }
 0x2b5   :  { %1961 = vmatpush1.bf16.msra.mxu1 %v2259_v20 }
 0x2b6   :  { %1962 = vmatprep.subr.bf16.mxu1 %v2268_v21 }
 0x2b9   :  { %1963 = vmatpush1.bf16.msra.mxu1 %v2267_v24 }
 0x2ba   :  { %1964 = vmatprep.subr.bf16.mxu1 %v2276_v25 }
 0x2bd   :  { %1965 = vmatpush1.bf16.msra.mxu1 %v2275_v28 }
 0x2be   :  { %1966 = vmatprep.subr.bf16.mxu1 %v2284_v29 }
 0x2c1   :  { %1967 = vmatpush1.bf16.msra.mxu1 %v2283_v30 }
 0x2c4   :  { %1969 = vmatmul.mubr.bf16.vlgmr.msra.gmra.mrb[12].mxu1 %v2671_v33  ;;  %v1147_v33 = vsub.s32 3, %v1134_v34 }
 0x2c6   :  { %v1148_v49 = vrot.slane %v1131_v36, %v1147_v33 }
 0x2d7   :  { %v1847_v40 = vpop.f32.mrb[0].mxu1 }
 0x2d8   :  { %v1848_v41 = vadd.f32 %v1847_v40, %v1136_v38  ;;  %v1849_v42 = vpop.f32.mrb[1].mxu1 }
 0x2d9   :  { %v1850_v43 = vadd.f32 %v1849_v42, %v1140_v39  ;;  %v1851_v44 = vpop.f32.mrb[2].mxu1 }
 0x2da   :  { %v1852_v45 = vpop.f32.mrb[3].mxu1 }
 0x2db   :  { %v2289_v46 = vpack.c.bf16 %v1850_v43, %v1848_v41 }
 0x2dd   :  { %2009 = vst [vmem:[#allocation7] sm:$0xff] %v2289_v46 }
 0x317   :  { %v1888_v50 = vpop.f32.mrb[4].mxu1 }
 0x318   :  { %v1889_v51 = vadd.f32 %v1888_v50, %v1144_v48  ;;  %v1890_v52 = vpop.f32.mrb[5].mxu1 }
 0x319   :  { %v1891_v53 = vadd.f32 %v1890_v52, %v1148_v49  ;;  %v1892_v32 = vpop.f32.mrb[6].mxu1 }
 0x31a   :  { %v1893_v54 = vpop.f32.mrb[7].mxu1 }
 0x31b   :  { %v2290_v55 = vpack.c.bf16 %v1891_v53, %v1889_v51 }
 0x31d   :  { %2010 = vst [vmem:[#allocation7 + $0x8] sm:$0xff] %v2290_v55 }
 0x357   :  { %v1929_v60 = vpop.f32.mrb[8].mxu1 }
 0x358   :  { %v1930_v61 = vadd.f32 %v1929_v60, %v1152_v58  ;;  %v1931_v62 = vpop.f32.mrb[9].mxu1 }
 0x359   :  { %v1932_v63 = vadd.f32 %v1931_v62, %v1156_v59  ;;  %v1933_v0 = vpop.f32.mrb[10].mxu1 }
 0x35a   :  { %v1934_v1 = vpop.f32.mrb[11].mxu1 }
 0x35b   :  { %v2291_v2 = vpack.c.bf16 %v1932_v63, %v1930_v61 }
 0x35d   :  { %2011 = vst [vmem:[#allocation7 + $0x10] sm:$0xff] %v2291_v2 }
 0x397   :  { %v1970_v7 = vpop.f32.mrb[12].mxu1 }
 0x398   :  { %v1971_v8 = vadd.f32 %v1970_v7, %v1160_v5  ;;  %v1972_v9 = vpop.f32.mrb[13].mxu1 }
 0x399   :  { %v1973_v10 = vadd.f32 %v1972_v9, %v1164_v6  ;;  %v1974_v11 = vpop.f32.mrb[14].mxu1 }
 0x39a   :  { %v1975_v12 = vpop.f32.mrb[15].mxu1 }
 0x39b   :  { %v2292_v13 = vpack.c.bf16 %v1973_v10, %v1971_v8 }
 0x39d   :  { %2012 = vst [vmem:[#allocation7 + $0x18] sm:$0xff] %v2292_v13 }
 0x39e   :  { %2561 = shalt.err (!%p2558_p6)
}
 0x39f   :  { %s2562_s17 = scalar_lea.hbm %s2701_s5, 512 }
 0x3a0   :  { %p2563_p7 = scmp.ne.s32.totalorder %s2701_s5, %s2562_s17  ;;  %p2566_p8 = scmp.lt.u32.totalorder %s2562_s17, %s2701_s5 }
 0x3a2   :  { %p2568_p9 = pnand %p2566_p8, %p2563_p7 }
 0x3a4   :  { %2571 = shalt.err (!%p2568_p9)
}
 0x3a5   :  { %2022 = dma.vmem_to_hbm [thread:$0]  %s2020_s14, 512, %s2701_s5, [#allocation4]  }
 0x3a6   :  { %2576 = dma.done.wait [#allocation4], 512  }
 0x3a7   :  { %2577 = vsyncadd [#allocation4], 4294966784 }
 0x3a8   :  { %2026 = vsyncpa [#allocation3], 1 }
 0x3a9   :  { %2027 = vsyncpa [#allocation6], 1 }
 0x3aa   :  { %2028 = vsyncpa [#allocation4], 1 }

</bundles_post_ra>
